<compile_context>
chip_gen: v7x
topology: tpu7x:2x2x1
jax: 0.10.0
libtpu: 0.0.40
codegen_flags: <defaults>
</compile_context>

<pallas_src>
import jax
import jax.numpy as jnp
from jax.experimental import pallas as pl
from jax.experimental.pallas import tpu as pltpu


BN_EPS = 9.99999974738e-06


# ----------------------------------------------------------------------------
# Fused kernel (single invocation, no grid):
#   x_ref     : (N,     Cin,   HW)   input images, NCHW-flat
#   w1s_ref   : (Cout1, Cin)         conv1 weights with BN scale folded in
#   shift_ref : (Cout1, 1)           folded BN shift (beta - mean*gamma/std)
#   w2_ref    : (Cout2, Cout1)       conv2 weights
#   o_ref     : (N,     Cout2, HW)   output, NCHW-flat
# ----------------------------------------------------------------------------
def fused_conv_bn_relu_conv_kernel(x_ref, w1s_ref, shift_ref, w2_ref, o_ref):
    n_imgs = x_ref.shape[0]
    # Hoist the (tiny) weight / shift loads out of the per-image loop.
    w1s = w1s_ref[...]
    shift = shift_ref[...]
    w2 = w2_ref[...]
    # Static unroll over the (tiny) batch; whole working set is VMEM-resident.
    for n in range(n_imgs):
        # conv1 (scale pre-folded into weights) as a channel matmul; the result
        # stays in channel-major (NCHW-flat) order -> no activation transpose.
        y = jnp.dot(w1s, x_ref[n], preferred_element_type=jnp.float32)
        # folded BN shift + ReLU (f32 VPU math on every generation).
        y = jnp.maximum(y + shift, 0.0)
        # conv2 as matmul; lane-dense (HW multiple of 128) store.
        o_ref[n] = jnp.dot(w2, y,
                           preferred_element_type=jnp.float32).astype(o_ref.dtype)


@jax.jit
def module1560_forward(x_nchw, params):
    N, Cin, H, W = x_nchw.shape
    HW = H * W
    w1 = params["conv1_w"]                       # (Cout1, Cin, 1, 1)
    w2 = params["conv2_w"]                       # (Cout2, Cout1, 1, 1)
    Cout1 = w1.shape[0]
    Cout2 = w2.shape[0]

    assert HW % 128 == 0, "H*W must be a multiple of 128 for lane-dense tiles"
    assert w1.shape[2] == w1.shape[3] == 1 and w2.shape[2] == w2.shape[3] == 1

    # Free reshapes / constant (weight-side) prep -- nothing on the activation
    # path except the contiguous NCHW -> (N, C, H*W) view.
    x_rows = x_nchw.reshape(N, Cin, HW)
    w1_mat = w1.reshape(Cout1, Cin)
    w2_mat = w2.reshape(Cout2, Cout1)

    # Fold BatchNorm (inference) into the conv1 weights (scale) and a single
    # per-channel shift vector.
    inv_std = jax.lax.rsqrt(params["bn_var"] + BN_EPS)
    scale = (params["bn_gamma"] * inv_std).reshape(Cout1, 1)
    w1_scaled = w1_mat * scale                                # exact weight-side fold
    shift = (params["bn_beta"]
             - params["bn_mean"] * params["bn_gamma"] * inv_std
             ).reshape(Cout1, 1)

    cost = pl.CostEstimate(
        flops=2 * N * HW * (Cin * Cout1 + Cout1 * Cout2),
        transcendentals=0,
        bytes_accessed=4 * (N * Cin * HW + N * Cout2 * HW
                            + Cout1 * Cin + Cout2 * Cout1 + Cout1),
    )

    out_flat = pl.pallas_call(
        fused_conv_bn_relu_conv_kernel,
        out_shape=jax.ShapeDtypeStruct((N, Cout2, HW), jnp.float32),
        in_specs=[
            pl.BlockSpec(memory_space=pltpu.MemorySpace.VMEM),  # x (full array)
            pl.BlockSpec(memory_space=pltpu.MemorySpace.VMEM),  # w1 (scaled)
            pl.BlockSpec(memory_space=pltpu.MemorySpace.VMEM),  # shift
            pl.BlockSpec(memory_space=pltpu.MemorySpace.VMEM),  # w2
        ],
        out_specs=pl.BlockSpec(memory_space=pltpu.MemorySpace.VMEM),
        cost_estimate=cost,
    )(x_rows, w1_scaled, shift, w2_mat)

    return out_flat.reshape(N, Cout2, H, W)


def init_params(key, cin, cout1, cout2):
    k1, k2, k3, k4, k5, k6 = jax.random.split(key, 6)
    return {
        "conv1_w": jax.random.normal(k1, (cout1, cin, 1, 1), jnp.float32) * 0.2,
        "conv2_w": jax.random.normal(k2, (cout2, cout1, 1, 1), jnp.float32) * 0.1,
        "bn_gamma": jnp.abs(jax.random.normal(k3, (cout1,), jnp.float32)) + 0.5,
        "bn_beta": jax.random.normal(k4, (cout1,), jnp.float32) * 0.1,
        "bn_mean": jax.random.normal(k5, (cout1,), jnp.float32) * 0.05,
        "bn_var": jnp.abs(jax.random.normal(k6, (cout1,), jnp.float32)) * 0.5 + 0.5,
    }


def reference_forward(x, params):
    """Pure-JAX reference mirroring torch semantics (conv -> BN -> ReLU -> conv)."""
    cout1 = params["conv1_w"].shape[0]
    cout2 = params["conv2_w"].shape[0]
    w1 = params["conv1_w"].reshape(cout1, -1)
    w2 = params["conv2_w"].reshape(cout2, -1)
    y = jnp.einsum("oi,nihw->nohw", w1, x)
    inv_std = jax.lax.rsqrt(params["bn_var"] + BN_EPS)
    scale = (params["bn_gamma"] * inv_std).reshape(1, cout1, 1, 1)
    shift = (params["bn_beta"]
             - params["bn_mean"] * params["bn_gamma"] * inv_std
             ).reshape(1, cout1, 1, 1)
    y = jnp.maximum(y * scale + shift, 0.0)
    return jnp.einsum("oi,nihw->nohw", w2, y)


if __name__ == "__main__":
    # Small shapes consistent with the module: batch=2, in_channels=4,
    # spatial=16x16, conv1: 4->16 (1x1), bn on 16 channels, conv2: 16->8 (1x1).
    N, Cin, H, W = 2, 4, 16, 16
    Cout1, Cout2 = 16, 8

    key = jax.random.PRNGKey(0)
    kx, kp = jax.random.split(key)
    x = jax.random.normal(kx, (N, Cin, H, W), jnp.float32)
    params = init_params(kp, Cin, Cout1, Cout2)

    out = module1560_forward(x, params)
    out = jax.block_until_ready(out)

    assert out.shape == (N, Cout2, H, W)
    assert bool(jnp.all(jnp.isfinite(out)))

    ref = reference_forward(x, params)
    assert bool(jnp.allclose(out, ref, rtol=1e-4, atol=1e-4)), (
        float(jnp.max(jnp.abs(out - ref))))

    print("KERNEL_OK")
</pallas_src>

<mosaic_0001>
module attributes {stable_mosaic.version = 11 : i64} {
  func.func @fused_conv_bn_relu_conv_kernel(%arg0: memref<2x4x256xf32, #tpu.memory_space<vmem>>, %arg1: memref<16x4xf32, #tpu.memory_space<vmem>>, %arg2: memref<16x1xf32, #tpu.memory_space<vmem>>, %arg3: memref<8x16xf32, #tpu.memory_space<vmem>>, %arg4: memref<2x8x256xf32, #tpu.memory_space<vmem>>) attributes {dimension_semantics = [], scalar_prefetch = 0 : i64, scratch_operands = 0 : i64, tpu.core_type = #tpu.core_type<tc>} {
    %c0 = arith.constant 0 : index
    %c0_0 = arith.constant 0 : index
    %0 = vector.load %arg1[%c0, %c0_0] : memref<16x4xf32, #tpu.memory_space<vmem>>, vector<16x4xf32>
    %c0_1 = arith.constant 0 : index
    %c0_2 = arith.constant 0 : index
    %1 = vector.load %arg2[%c0_1, %c0_2] : memref<16x1xf32, #tpu.memory_space<vmem>>, vector<16x1xf32>
    %c0_3 = arith.constant 0 : index
    %c0_4 = arith.constant 0 : index
    %2 = vector.load %arg3[%c0_3, %c0_4] : memref<8x16xf32, #tpu.memory_space<vmem>>, vector<8x16xf32>
    %c0_5 = arith.constant 0 : index
    %c0_6 = arith.constant 0 : index
    %c0_7 = arith.constant 0 : index
    %3 = vector.load %arg0[%c0_5, %c0_6, %c0_7] : memref<2x4x256xf32, #tpu.memory_space<vmem>>, vector<1x4x256xf32>
    %4 = vector.shape_cast %3 : vector<1x4x256xf32> to vector<4x256xf32>
    %cst = arith.constant dense<0.000000e+00> : vector<16x256xf32>
    %5 = tpu.matmul %0, %4, %cst {dimension_numbers = #tpu.dot_dimension_numbers<[1], [0], [0], [1], [0, 0, 1, 1], [], []>} : vector<16x4xf32>, vector<4x256xf32>, vector<16x256xf32> -> vector<16x256xf32>
    %6 = vector.broadcast %1 : vector<16x1xf32> to vector<16x256xf32>
    %7 = arith.addf %5, %6 : vector<16x256xf32>
    %cst_8 = arith.constant 0.000000e+00 : f32
    %8 = vector.broadcast %cst_8 : f32 to vector<16x256xf32>
    %9 = arith.maximumf %7, %8 : vector<16x256xf32>
    %cst_9 = arith.constant dense<0.000000e+00> : vector<8x256xf32>
    %10 = tpu.matmul %2, %9, %cst_9 {dimension_numbers = #tpu.dot_dimension_numbers<[1], [0], [0], [1], [0, 0, 1, 1], [], []>} : vector<8x16xf32>, vector<16x256xf32>, vector<8x256xf32> -> vector<8x256xf32>
    %c0_10 = arith.constant 0 : index
    %c0_11 = arith.constant 0 : index
    %c0_12 = arith.constant 0 : index
    %11 = vector.load %arg4[%c0_10, %c0_11, %c0_12] : memref<2x8x256xf32, #tpu.memory_space<vmem>>, vector<1x8x256xf32>
    %12 = vector.shape_cast %11 : vector<1x8x256xf32> to vector<8x256xf32>
    %13 = vector.shape_cast %10 : vector<8x256xf32> to vector<1x8x256xf32>
    tpu.vector_store %arg4[%c0_10, %c0_11, %c0_12], %13 {strides = array<i32>} : memref<2x8x256xf32, #tpu.memory_space<vmem>>, vector<1x8x256xf32>,
    %c1 = arith.constant 1 : index
    %c0_13 = arith.constant 0 : index
    %c0_14 = arith.constant 0 : index
    %14 = vector.load %arg0[%c1, %c0_13, %c0_14] : memref<2x4x256xf32, #tpu.memory_space<vmem>>, vector<1x4x256xf32>
    %15 = vector.shape_cast %14 : vector<1x4x256xf32> to vector<4x256xf32>
    %cst_15 = arith.constant dense<0.000000e+00> : vector<16x256xf32>
    %16 = tpu.matmul %0, %15, %cst_15 {dimension_numbers = #tpu.dot_dimension_numbers<[1], [0], [0], [1], [0, 0, 1, 1], [], []>} : vector<16x4xf32>, vector<4x256xf32>, vector<16x256xf32> -> vector<16x256xf32>
    %17 = vector.broadcast %1 : vector<16x1xf32> to vector<16x256xf32>
    %18 = arith.addf %16, %17 : vector<16x256xf32>
    %cst_16 = arith.constant 0.000000e+00 : f32
    %19 = vector.broadcast %cst_16 : f32 to vector<16x256xf32>
    %20 = arith.maximumf %18, %19 : vector<16x256xf32>
    %cst_17 = arith.constant dense<0.000000e+00> : vector<8x256xf32>
    %21 = tpu.matmul %2, %20, %cst_17 {dimension_numbers = #tpu.dot_dimension_numbers<[1], [0], [0], [1], [0, 0, 1, 1], [], []>} : vector<8x16xf32>, vector<16x256xf32>, vector<8x256xf32> -> vector<8x256xf32>
    %c1_18 = arith.constant 1 : index
    %c0_19 = arith.constant 0 : index
    %c0_20 = arith.constant 0 : index
    %22 = vector.load %arg4[%c1_18, %c0_19, %c0_20] : memref<2x8x256xf32, #tpu.memory_space<vmem>>, vector<1x8x256xf32>
    %23 = vector.shape_cast %22 : vector<1x8x256xf32> to vector<8x256xf32>
    %24 = vector.shape_cast %21 : vector<8x256xf32> to vector<1x8x256xf32>
    tpu.vector_store %arg4[%c1_18, %c0_19, %c0_20], %24 {strides = array<i32>} : memref<2x8x256xf32, #tpu.memory_space<vmem>>, vector<1x8x256xf32>,
    return
  }
}

</mosaic_0001>

<bundles_post_ra>
// kernel: module1560_forward.1
= control target key start
LH: loop header
LB: loop body
LE: loop exit
PB: predicated region body
PF: predicated region fallthrough
CT: control target
= control target key end

     0   :  { %vm42_vm0 = vcmask 1043456   ;;  %v398_v1 = vmov 0.0   ;;  %v399_v2 = vmov 0   ;;  %vm35_vm1 = vcmask 31744   ;;  %s468_s0 = inlined_call_operand.vmem [shape: f32[2,4,256], index: 0, kind: input, shape index: {}]   ;;  %s469_s1 = inlined_call_operand.vmem [shape: f32[16,4], index: 1, kind: input, shape index: {}]   ;;  %s470_s2 = inlined_call_operand.vmem [shape: f32[16,1], index: 2, kind: input, shape index: {}]   ;;  %s471_s3 = inlined_call_operand.vmem [shape: f32[8,16], index: 3, kind: input, shape index: {}]   ;;  %s472_s4 = inlined_call_operand.vmem [shape: f32[2,8,256], index: 4, kind: output, shape index: {}]  }
   0x1   :  { %v22_v0 = vld [vmem:[%s468_s0] sm:$0xff]  ;;  %111 = vmatprep.mubr.f32.mxu0 %v398_v1  ;;  %395 = vset.pattern.permute.xlu0 %v399_v2  ;;  %v20_v6 = vld [vmem:[%s470_s2 + $0x8] sm:$0xff]  ;;  %vm128_vm2 = vcmask 130048  }
   0x2   :  { %v34_v3 = vcombine.high %v22_v0, %v22_v0  ;;  %v19_v4 = vld [vmem:[%s470_s2] sm:$0xff]  ;;  %196 = vmatprep.mubr.f32.mxu1 %v398_v1  ;;  %v18_v7 = vld [vmem:[%s469_s1 + $0x8] sm:$0xff] }
   0x3   :  { %v17_v5 = vld [vmem:[%s469_s1] sm:$0xff]  ;;  %25 = vperm.xlu0 %395, %v19_v4   ;;  %v377_v18 = vld [vmem:[%s468_s0 + $0x8] sm:$0xff] }
   0x4   :  { %372 = vmatprep.subr.msk.mxu0 %vm42_vm0, %v34_v3  ;;  %v208_v24 = vcombine.high %v377_v18, %v377_v18  ;;  %v21_v26 = vld [vmem:[%s471_s3] sm:$0xff] }
   0x5   :  { %373 = vmatpush1.msk.msra.mxu0 %vm42_vm0, %v22_v0 }
   0x6   :  { %374 = vmatmul.mubr.msk.f32.vlgmr.msra.gmra.mrb[0].mxu0 %vm35_vm1, %v17_v5 }
   0x7   :  { %117 = vmatprep.mubr.f32.mxu0 %v398_v1  ;;  %30 = vperm.xlu0 %395, %v20_v6  }
   0xa   :  { %375 = vmatmul.mubr.msk.f32.gmra.mrb[2].mxu0 %vm35_vm1, %v18_v7 }
   0xb   :  { %358 = vmatprep.mubr.f32.mxu0 %v398_v1 }
  0x82   :  { %v26_v8 = vpop.permute.xlu0 %25 }
  0x86   :  { %v31_v12 = vpop.permute.xlu0 %30 }
  0xd9   :  { %v113_v9 = vpop.f32.mrb[0].mxu0 }
  0xda   :  { %v115_v10 = vpop.f32.mrb[1].mxu0  ;;  %v114_v11 = vadd.f32 %v113_v9, %v26_v8 }
  0xdb   :  { %v116_v13 = vadd.f32 %v115_v10, %v26_v8 }
  0xdc   :  { %v124_v19 = vmax.f32 %v114_v11, 0.0 }
  0xdd   :  { %v119_v14 = vpop.f32.mrb[2].mxu0  ;;  %v125_v21 = vmax.f32 %v116_v13, 0.0 }
  0xde   :  { %v120_v15 = vadd.f32 %v119_v14, %v31_v12  ;;  %v121_v16 = vpop.f32.mrb[3].mxu0 }
  0xdf   :  { %v122_v17 = vadd.f32 %v121_v16, %v31_v12 }
  0xe0   :  { %v126_v20 = vmax.f32 %v120_v15, 0.0 }
  0xe1   :  { %v127_v22 = vmax.f32 %v122_v17, 0.0 }
  0xe2   :  { %v387_v23 = vpack.c.bf16 %v126_v20, %v124_v19 }
  0xe3   :  { %v385_v25 = vpack.c.bf16 %v127_v22, %v125_v21 }
  0xe5   :  { %386 = vmatprep.subr.bf16.mxu1 %v385_v25 }
  0xe6   :  { %388 = vmatpush1.bf16.msra.mxu1 %v387_v23 }
  0xe7   :  { %378 = vmatprep.subr.msk.mxu1 %vm42_vm0, %v208_v24 }
  0xe9   :  { %376 = vmatmul.mubr.msk.f32.vlgmr.msra.gmra.mrb[0].mxu1 %vm128_vm2, %v21_v26 }
  0xea   :  { %379 = vmatpush1.msk.msra.mxu1 %vm42_vm0, %v377_v18  ;;  %277 = vmatprep.mubr.f32.mxu1 %v398_v1 }
  0xed   :  { %380 = vmatmul.mubr.msk.f32.vlgmr.msra.gmra.mrb[2].mxu1 %vm35_vm1, %v17_v5 }
  0xee   :  { %283 = vmatprep.mubr.f32.mxu1 %v398_v1 }
  0xf1   :  { %381 = vmatmul.mubr.msk.f32.gmra.mrb[4].mxu1 %vm35_vm1, %v18_v7 }
 0x1bc   :  { %v198_v27 = vpop.f32.mrb[0].mxu1 }
 0x1bd   :  { %203 = vst [vmem:[%s472_s4] sm:$0xff] %v198_v27  ;;  %v200_v28 = vpop.f32.mrb[1].mxu1 }
 0x1be   :  { %204 = vst [vmem:[%s472_s4 + $0x8] sm:$0xff] %v200_v28 }
 0x1c0   :  { %v279_v29 = vpop.f32.mrb[2].mxu1 }
 0x1c1   :  { %v281_v30 = vpop.f32.mrb[3].mxu1  ;;  %v280_v31 = vadd.f32 %v279_v29, %v26_v8 }
 0x1c2   :  { %v282_v32 = vadd.f32 %v281_v30, %v26_v8 }
 0x1c3   :  { %v290_v37 = vmax.f32 %v280_v31, 0.0 }
 0x1c4   :  { %v285_v33 = vpop.f32.mrb[4].mxu1  ;;  %v291_v39 = vmax.f32 %v282_v32, 0.0 }
 0x1c5   :  { %v286_v34 = vadd.f32 %v285_v33, %v31_v12  ;;  %v287_v35 = vpop.f32.mrb[5].mxu1 }
 0x1c6   :  { %v288_v36 = vadd.f32 %v287_v35, %v31_v12 }
 0x1c7   :  { %v292_v38 = vmax.f32 %v286_v34, 0.0 }
 0x1c8   :  { %v293_v40 = vmax.f32 %v288_v36, 0.0 }
 0x1c9   :  { %v391_v41 = vpack.c.bf16 %v292_v38, %v290_v37 }
 0x1ca   :  { %v389_v42 = vpack.c.bf16 %v293_v40, %v291_v39 }
 0x1cc   :  { %390 = vmatprep.subr.bf16.mxu0 %v389_v42 }
 0x1cd   :  { %392 = vmatpush1.bf16.msra.mxu0 %v391_v41 }
 0x1d0   :  { %382 = vmatmul.mubr.msk.f32.vlgmr.msra.gmra.mrb[4].mxu0 %vm128_vm2, %v21_v26 }
 0x2a3   :  { %v360_v43 = vpop.f32.mrb[4].mxu0 }
 0x2a4   :  { %383 = vst [vmem:[%s472_s4 + $0x10] sm:$0xff] %v360_v43  ;;  %v362_v44 = vpop.f32.mrb[5].mxu0 }
 0x2a5   :  { %384 = vst [vmem:[%s472_s4 + $0x18] sm:$0xff] %v362_v44 }

</bundles_post_ra>
